<compile_context>
chip_gen: v7x
topology: tpu7x:2x2x1
jax: 0.10.0
libtpu: 0.0.40
codegen_flags: <defaults>
</compile_context>

<pallas_src>
import functools

import jax
import jax.numpy as jnp
from jax.experimental import pallas as pl
from jax.experimental.pallas import tpu as pltpu


def _sense_sums_kernel(pred_ref, tgt_ref, inter_out, a_out, b_out,
                       inter_acc, a_acc, b_acc, *,
                       hw_total, tile, tiles_per_chunk, chunks_per_batch,
                       outchannels, label_smoothing, masked, needs_tail_mask):
    """Accumulates per-channel [intersection, A_sum, B_sum] for one chunk."""
    p_i = pl.program_id(0)      # parallel chunk index (batch x spatial split)
    t_i = pl.program_id(1)      # sequential tile index within the chunk

    @pl.when(t_i == 0)
    def _():
        inter_acc[...] = jnp.zeros_like(inter_acc)
        a_acc[...] = jnp.zeros_like(a_acc)
        b_acc[...] = jnp.zeros_like(b_acc)

    p = jax.nn.sigmoid(pred_ref[0].astype(jnp.float32))     # (C, tl), act=Sigmoid
    t_raw = tgt_ref[0].astype(jnp.float32)                  # (C, tl)
    tl = p.shape[-1]

    # Select mask: `masked` mode keeps one-hot locations; tail mask keeps only
    # in-bounds lanes (ragged H*W tail and/or over-allocated chunk tiles).
    sel = None
    if masked:
        # mask computed from the *un-smoothed* target, as in the reference
        sel = jnp.sum(t_raw, axis=0, keepdims=True) == 1.0   # (1, tl)
    if needs_tail_mask:
        if chunks_per_batch == 1:
            tile_idx = t_i
        else:
            tile_idx = (p_i % chunks_per_batch) * tiles_per_chunk + t_i
        idx = jax.lax.broadcasted_iota(jnp.int32, (1, tl), 1) + tile_idx * tile
        valid = idx < hw_total
        sel = valid if sel is None else jnp.logical_and(sel, valid)

    # Label smoothing (applied after mask computation, as in the reference).
    if label_smoothing:
        t = t_raw * (1.0 - label_smoothing) + label_smoothing / outchannels
    else:
        t = t_raw

    if sel is not None:
        # jnp.where (not multiply) so garbage in out-of-bounds lanes can never
        # propagate (even if it were NaN/Inf).
        p = jnp.where(sel, p, 0.0)
        t = jnp.where(sel, t, 0.0)

    inter_acc[...] += jnp.sum(p * t, axis=1, keepdims=True)  # (C, 1)
    a_acc[...] += jnp.sum(p, axis=1, keepdims=True)
    b_acc[...] += jnp.sum(t, axis=1, keepdims=True)

    @pl.when(t_i == pl.num_programs(1) - 1)
    def _():
        inter_out[0] = inter_acc[...]
        a_out[0] = a_acc[...]
        b_out[0] = b_acc[...]


def _choose_tile(hw, c, p_bytes, t_bytes, max_tile=None,
                 vmem_budget_bytes=8 << 20, cap=1 << 17):
    """Largest lane tile fitting the VMEM budget (2 inputs x 2 buffers)."""
    per_lane = 2 * c * (p_bytes + t_bytes)       # both inputs, double-buffered
    tl = min(cap, max(128, vmem_budget_bytes // per_lane))
    if max_tile is not None:
        tl = min(tl, max_tile)
    tl = max(128, (tl // 128) * 128)             # lane-aligned
    if hw <= tl:
        return hw                                # single full-extent tile
    return tl


def senseloss_pallas(pred, target, *, smooth=1.0, w=(1.0,), outchannels=1,
                     label_smoothing=0.0, masked=False, max_tile=None):
    """Pallas equivalent of senseloss.forward(pred, target). Inputs are NCHW."""
    if len(w) != outchannels:
        raise ValueError('Loss weights should be equal to the output channels.')

    N, C, H, W = pred.shape
    assert C == outchannels, "outchannels must match channel dim of inputs"
    HW = H * W

    # Free metadata reshape (trailing-dim collapse); no transpose, no pad,
    # no dtype cast -- the tensors stream through the kernel in native dtype.
    pred3 = pred.reshape(N, C, HW)
    tgt3 = target.reshape(N, C, HW)

    tl = _choose_tile(HW, C, pred.dtype.itemsize, target.dtype.itemsize,
                      max_tile=max_tile)
    n_tiles = pl.cdiv(HW, tl)

    # v7x megacore: keep >= 2 independent ("parallel") chunks where possible.
    # With N >= 2 the batch axis suffices; with N == 1 split the tile axis.
    S = 1 if N >= 2 else min(2, n_tiles)
    tiles_per_chunk = pl.cdiv(n_tiles, S)
    P = N * S

    needs_tail_mask = (HW % tl != 0) or (tiles_per_chunk * S != n_tiles)

    if S == 1:
        def in_map(p, t):
            return (p, 0, t)
    else:
        clamp = (tiles_per_chunk * S != n_tiles)

        def in_map(p, t):
            tile_idx = (p % S) * tiles_per_chunk + t
            if clamp:
                # Over-allocated tiles of the last chunk re-read an in-range
                # tile; the kernel's tail mask zeroes their contribution.
                tile_idx = jnp.minimum(tile_idx, n_tiles - 1)
            return (p // S, 0, tile_idx)

    kernel = functools.partial(
        _sense_sums_kernel, hw_total=HW, tile=tl,
        tiles_per_chunk=tiles_per_chunk, chunks_per_batch=S,
        outchannels=outchannels, label_smoothing=float(label_smoothing),
        masked=bool(masked), needs_tail_mask=needs_tail_mask)

    out_struct = jax.ShapeDtypeStruct((P, C, 1), jnp.float32)
    out_spec = pl.BlockSpec((1, C, 1), lambda p, t: (p, 0, 0))
    inter, a_sum, b_sum = pl.pallas_call(
        kernel,
        out_shape=(out_struct, out_struct, out_struct),
        grid_spec=pltpu.PrefetchScalarGridSpec(
            num_scalar_prefetch=0,
            grid=(P, tiles_per_chunk),
            in_specs=[pl.BlockSpec((1, C, tl), in_map),
                      pl.BlockSpec((1, C, tl), in_map)],
            out_specs=[out_spec, out_spec, out_spec],
            scratch_shapes=[pltpu.VMEM((C, 1), jnp.float32),
                            pltpu.VMEM((C, 1), jnp.float32),
                            pltpu.VMEM((C, 1), jnp.float32)],
        ),
        # Chunks are independent partial reductions -> parallel; the tile axis
        # carries the accumulator -> arbitrary.
        compiler_params=pltpu.CompilerParams(
            dimension_semantics=("parallel", "arbitrary")),
    )(pred3, tgt3)

    # Tiny scalar epilogue in JAX: combine per-chunk partials, then IoU.
    inter = jnp.sum(inter[:, :, 0], axis=0)
    a_sum = jnp.sum(a_sum[:, :, 0], axis=0)
    b_sum = jnp.sum(b_sum[:, :, 0], axis=0)
    union = a_sum + b_sum - inter
    iou = -(inter + smooth) / (union + smooth)
    return jnp.sum(iou * jnp.asarray(w, dtype=jnp.float32))


def _senseloss_ref(pred, target, *, smooth, w, outchannels, label_smoothing, masked):
    """Pure-JAX reference mirroring the PyTorch forward, for verification."""
    if masked:
        mask = jnp.sum(target, axis=1) == 1
    else:
        mask = jnp.ones((target.shape[0], target.shape[2], target.shape[3]), bool)
    target = target * (1 - label_smoothing) + label_smoothing / outchannels
    p = jax.nn.sigmoid(pred).transpose(0, 2, 3, 1)      # NHWC
    t = target.transpose(0, 2, 3, 1)
    m = mask[..., None].astype(p.dtype)
    inter = jnp.sum(p * t * m, axis=(0, 1, 2))
    a = jnp.sum(p * m, axis=(0, 1, 2))
    b = jnp.sum(t * m, axis=(0, 1, 2))
    union = a + b - inter
    iou = -(inter + smooth) / (union + smooth)
    return jnp.sum(iou * jnp.asarray(w, p.dtype))


if __name__ == "__main__":
    key = jax.random.PRNGKey(0)
    k1, k2, k3, k4, k5 = jax.random.split(key, 5)

    # -- config A: unmasked, label smoothing, single-tile path ---------------
    N, C, H, W = 2, 4, 16, 16
    pred = jax.random.normal(k1, (N, C, H, W), dtype=jnp.float32)
    target = (jax.random.uniform(k2, (N, C, H, W)) > 0.5).astype(jnp.float32)
    cfg_a = dict(smooth=1.0, w=(1.0, 0.5, 2.0, 1.5), outchannels=C,
                 label_smoothing=0.1, masked=False)
    loss_a = jax.block_until_ready(senseloss_pallas(pred, target, **cfg_a))
    ref_a = _senseloss_ref(pred, target, **cfg_a)
    assert jnp.allclose(loss_a, ref_a, rtol=1e-5, atol=1e-5), (loss_a, ref_a)

    # -- config B: masked mode, one-hot targets with some dropped pixels -----
    labels = jax.random.randint(k3, (N, H, W), 0, C)
    onehot = jax.nn.one_hot(labels, C, axis=1, dtype=jnp.float32)   # (N,C,H,W)
    drop = jax.random.uniform(k4, (N, 1, H, W)) < 0.3
    target_m = jnp.where(drop, 0.0, onehot)
    cfg_b = dict(smooth=1.0, w=(1.0, 1.0, 1.0, 1.0), outchannels=C,
                 label_smoothing=0.0, masked=True)
    loss_b = jax.block_until_ready(senseloss_pallas(pred, target_m, **cfg_b))
    ref_b = _senseloss_ref(pred, target_m, **cfg_b)
    assert jnp.allclose(loss_b, ref_b, rtol=1e-5, atol=1e-5), (loss_b, ref_b)

    # -- config C: ragged H*W tail + multi-tile path (forced small tile) -----
    H2, W2 = 16, 20                              # HW = 320 -> tiles of 128 + tail
    pred_c = jax.random.normal(k5, (N, C, H2, W2), dtype=jnp.float32)
    target_c = (jax.random.uniform(k2, (N, C, H2, W2)) > 0.5).astype(jnp.float32)
    loss_c = jax.block_until_ready(
        senseloss_pallas(pred_c, target_c, max_tile=128, **cfg_a))
    ref_c = _senseloss_ref(pred_c, target_c, **cfg_a)
    assert jnp.allclose(loss_c, ref_c, rtol=1e-5, atol=1e-5), (loss_c, ref_c)

    # -- config D: batch=1 -> megacore spatial split with uneven chunk sizes -
    pred_d = pred_c[:1]
    target_d = target_c[:1]
    loss_d = jax.block_until_ready(
        senseloss_pallas(pred_d, target_d, max_tile=128, **cfg_a))
    ref_d = _senseloss_ref(pred_d, target_d, **cfg_a)
    assert jnp.allclose(loss_d, ref_d, rtol=1e-5, atol=1e-5), (loss_d, ref_d)

    # TODO(synk): module allows an arbitrary `act` callable; only the default
    # Sigmoid activation is implemented inside the kernel.
    print("KERNEL_OK")
</pallas_src>

<mosaic_0001>
module attributes {stable_mosaic.version = 11 : i64} {
  func.func @_sense_sums_kernel(%arg0: i32, %arg1: i32, %arg2: memref<1x4x256xf32, #tpu.memory_space<vmem>>, %arg3: memref<1x4x256xf32, #tpu.memory_space<vmem>>, %arg4: memref<1x4x1xf32, #tpu.memory_space<vmem>>, %arg5: memref<1x4x1xf32, #tpu.memory_space<vmem>>, %arg6: memref<1x4x1xf32, #tpu.memory_space<vmem>>, %arg7: memref<4x1xf32, #tpu.memory_space<vmem>>, %arg8: memref<4x1xf32, #tpu.memory_space<vmem>>, %arg9: memref<4x1xf32, #tpu.memory_space<vmem>>) attributes {dimension_semantics = [#tpu.dimension_semantics<parallel>, #tpu.dimension_semantics<arbitrary>], iteration_bounds = array<i64: 2, 1>, scalar_prefetch = 0 : i64, scratch_operands = 3 : i64, tpu.core_type = #tpu.core_type<tc>, window_params = [{transform_indices = @transform_0, window_bounds = array<i64: 1, 4, 256>}, {transform_indices = @transform_1, window_bounds = array<i64: 1, 4, 256>}, {transform_indices = @transform_2, window_bounds = array<i64: 1, 4, 1>}, {transform_indices = @transform_3, window_bounds = array<i64: 1, 4, 1>}, {transform_indices = @transform_4, window_bounds = array<i64: 1, 4, 1>}]} {
    %c0_i32 = arith.constant 0 : i32
    %0 = arith.cmpi eq, %arg1, %c0_i32 : i32
    %1 = arith.extui %0 : i1 to i32
    %c0_i32_0 = arith.constant 0 : i32
    %2 = arith.cmpi ne, %1, %c0_i32_0 : i32
    scf.if %2 {
      %cst_25 = arith.constant 0.000000e+00 : f32
      %35 = vector.broadcast %cst_25 : f32 to vector<4x1xf32>
      %c0_26 = arith.constant 0 : index
      %c0_27 = arith.constant 0 : index
      %36 = vector.load %arg7[%c0_26, %c0_27] : memref<4x1xf32, #tpu.memory_space<vmem>>, vector<4x1xf32>
      tpu.vector_store %arg7[%c0_26, %c0_27], %35 {strides = array<i32>} : memref<4x1xf32, #tpu.memory_space<vmem>>, vector<4x1xf32>,
      %cst_28 = arith.constant 0.000000e+00 : f32
      %37 = vector.broadcast %cst_28 : f32 to vector<4x1xf32>
      %c0_29 = arith.constant 0 : index
      %c0_30 = arith.constant 0 : index
      %38 = vector.load %arg8[%c0_29, %c0_30] : memref<4x1xf32, #tpu.memory_space<vmem>>, vector<4x1xf32>
      tpu.vector_store %arg8[%c0_29, %c0_30], %37 {strides = array<i32>} : memref<4x1xf32, #tpu.memory_space<vmem>>, vector<4x1xf32>,
      %cst_31 = arith.constant 0.000000e+00 : f32
      %39 = vector.broadcast %cst_31 : f32 to vector<4x1xf32>
      %c0_32 = arith.constant 0 : index
      %c0_33 = arith.constant 0 : index
      %40 = vector.load %arg9[%c0_32, %c0_33] : memref<4x1xf32, #tpu.memory_space<vmem>>, vector<4x1xf32>
      tpu.vector_store %arg9[%c0_32, %c0_33], %39 {strides = array<i32>} : memref<4x1xf32, #tpu.memory_space<vmem>>, vector<4x1xf32>,
    } else {
    }
    %c0 = arith.constant 0 : index
    %c0_1 = arith.constant 0 : index
    %c0_2 = arith.constant 0 : index
    %3 = vector.load %arg2[%c0, %c0_1, %c0_2] : memref<1x4x256xf32, #tpu.memory_space<vmem>>, vector<1x4x256xf32>
    %4 = vector.shape_cast %3 : vector<1x4x256xf32> to vector<4x256xf32>
    %5 = arith.negf %4 : vector<4x256xf32>
    %6 = math.exp %5 : vector<4x256xf32>
    %cst = arith.constant 1.000000e+00 : f32
    %7 = vector.broadcast %cst : f32 to vector<4x256xf32>
    %8 = arith.addf %7, %6 : vector<4x256xf32>
    %9 = arith.divf %7, %8 : vector<4x256xf32>
    %c0_3 = arith.constant 0 : index
    %c0_4 = arith.constant 0 : index
    %c0_5 = arith.constant 0 : index
    %10 = vector.load %arg3[%c0_3, %c0_4, %c0_5] : memref<1x4x256xf32, #tpu.memory_space<vmem>>, vector<1x4x256xf32>
    %11 = vector.shape_cast %10 : vector<1x4x256xf32> to vector<4x256xf32>
    %cst_6 = arith.constant 0.899999976 : f32
    %12 = vector.broadcast %cst_6 : f32 to vector<4x256xf32>
    %13 = arith.mulf %11, %12 : vector<4x256xf32>
    %cst_7 = arith.constant 2.500000e-02 : f32
    %14 = vector.broadcast %cst_7 : f32 to vector<4x256xf32>
    %15 = arith.addf %13, %14 : vector<4x256xf32>
    %c0_8 = arith.constant 0 : index
    %c0_9 = arith.constant 0 : index
    %16 = vector.load %arg7[%c0_8, %c0_9] : memref<4x1xf32, #tpu.memory_space<vmem>>, vector<4x1xf32>
    %17 = arith.mulf %9, %15 : vector<4x256xf32>
    %cst_10 = arith.constant dense<0.000000e+00> : vector<4xf32>
    %18 = vector.multi_reduction <add>, %17, %cst_10 [1] : vector<4x256xf32> to vector<4xf32>
    %19 = vector.shape_cast %18 : vector<4xf32> to vector<4x1xf32>
    %20 = arith.addf %16, %19 : vector<4x1xf32>
    %c0_11 = arith.constant 0 : index
    %c0_12 = arith.constant 0 : index
    %21 = vector.load %arg7[%c0_11, %c0_12] : memref<4x1xf32, #tpu.memory_space<vmem>>, vector<4x1xf32>
    tpu.vector_store %arg7[%c0_11, %c0_12], %20 {strides = array<i32>} : memref<4x1xf32, #tpu.memory_space<vmem>>, vector<4x1xf32>,
    %c0_13 = arith.constant 0 : index
    %c0_14 = arith.constant 0 : index
    %22 = vector.load %arg8[%c0_13, %c0_14] : memref<4x1xf32, #tpu.memory_space<vmem>>, vector<4x1xf32>
    %cst_15 = arith.constant dense<0.000000e+00> : vector<4xf32>
    %23 = vector.multi_reduction <add>, %9, %cst_15 [1] : vector<4x256xf32> to vector<4xf32>
    %24 = vector.shape_cast %23 : vector<4xf32> to vector<4x1xf32>
    %25 = arith.addf %22, %24 : vector<4x1xf32>
    %c0_16 = arith.constant 0 : index
    %c0_17 = arith.constant 0 : index
    %26 = vector.load %arg8[%c0_16, %c0_17] : memref<4x1xf32, #tpu.memory_space<vmem>>, vector<4x1xf32>
    tpu.vector_store %arg8[%c0_16, %c0_17], %25 {strides = array<i32>} : memref<4x1xf32, #tpu.memory_space<vmem>>, vector<4x1xf32>,
    %c0_18 = arith.constant 0 : index
    %c0_19 = arith.constant 0 : index
    %27 = vector.load %arg9[%c0_18, %c0_19] : memref<4x1xf32, #tpu.memory_space<vmem>>, vector<4x1xf32>
    %cst_20 = arith.constant dense<0.000000e+00> : vector<4xf32>
    %28 = vector.multi_reduction <add>, %15, %cst_20 [1] : vector<4x256xf32> to vector<4xf32>
    %29 = vector.shape_cast %28 : vector<4xf32> to vector<4x1xf32>
    %30 = arith.addf %27, %29 : vector<4x1xf32>
    %c0_21 = arith.constant 0 : index
    %c0_22 = arith.constant 0 : index
    %31 = vector.load %arg9[%c0_21, %c0_22] : memref<4x1xf32, #tpu.memory_space<vmem>>, vector<4x1xf32>
    tpu.vector_store %arg9[%c0_21, %c0_22], %30 {strides = array<i32>} : memref<4x1xf32, #tpu.memory_space<vmem>>, vector<4x1xf32>,
    %c0_i32_23 = arith.constant 0 : i32
    %32 = arith.cmpi eq, %arg1, %c0_i32_23 : i32
    %33 = arith.extui %32 : i1 to i32
    %c0_i32_24 = arith.constant 0 : i32
    %34 = arith.cmpi ne, %33, %c0_i32_24 : i32
    scf.if %34 {
      %c0_25 = arith.constant 0 : index
      %c0_26 = arith.constant 0 : index
      %35 = vector.load %arg7[%c0_25, %c0_26] : memref<4x1xf32, #tpu.memory_space<vmem>>, vector<4x1xf32>
      %c0_27 = arith.constant 0 : index
      %c0_28 = arith.constant 0 : index
      %c0_29 = arith.constant 0 : index
      %36 = vector.load %arg4[%c0_27, %c0_28, %c0_29] : memref<1x4x1xf32, #tpu.memory_space<vmem>>, vector<1x4x1xf32>
      %37 = vector.shape_cast %36 : vector<1x4x1xf32> to vector<4x1xf32>
      %38 = vector.shape_cast %35 : vector<4x1xf32> to vector<1x4x1xf32>
      tpu.vector_store %arg4[%c0_27, %c0_28, %c0_29], %38 {strides = array<i32>} : memref<1x4x1xf32, #tpu.memory_space<vmem>>, vector<1x4x1xf32>,
      %c0_30 = arith.constant 0 : index
      %c0_31 = arith.constant 0 : index
      %39 = vector.load %arg8[%c0_30, %c0_31] : memref<4x1xf32, #tpu.memory_space<vmem>>, vector<4x1xf32>
      %c0_32 = arith.constant 0 : index
      %c0_33 = arith.constant 0 : index
      %c0_34 = arith.constant 0 : index
      %40 = vector.load %arg5[%c0_32, %c0_33, %c0_34] : memref<1x4x1xf32, #tpu.memory_space<vmem>>, vector<1x4x1xf32>
      %41 = vector.shape_cast %40 : vector<1x4x1xf32> to vector<4x1xf32>
      %42 = vector.shape_cast %39 : vector<4x1xf32> to vector<1x4x1xf32>
      tpu.vector_store %arg5[%c0_32, %c0_33, %c0_34], %42 {strides = array<i32>} : memref<1x4x1xf32, #tpu.memory_space<vmem>>, vector<1x4x1xf32>,
      %c0_35 = arith.constant 0 : index
      %c0_36 = arith.constant 0 : index
      %43 = vector.load %arg9[%c0_35, %c0_36] : memref<4x1xf32, #tpu.memory_space<vmem>>, vector<4x1xf32>
      %c0_37 = arith.constant 0 : index
      %c0_38 = arith.constant 0 : index
      %c0_39 = arith.constant 0 : index
      %44 = vector.load %arg6[%c0_37, %c0_38, %c0_39] : memref<1x4x1xf32, #tpu.memory_space<vmem>>, vector<1x4x1xf32>
      %45 = vector.shape_cast %44 : vector<1x4x1xf32> to vector<4x1xf32>
      %46 = vector.shape_cast %43 : vector<4x1xf32> to vector<1x4x1xf32>
      tpu.vector_store %arg6[%c0_37, %c0_38, %c0_39], %46 {strides = array<i32>} : memref<1x4x1xf32, #tpu.memory_space<vmem>>, vector<1x4x1xf32>,
    } else {
    }
    return
  }
  func.func @transform_0(%arg0: i32, %arg1: i32) -> (i32, i32, i32) {
    %c0_i32 = arith.constant 0 : i32
    %c0_i32_0 = arith.constant 0 : i32
    return %arg0, %c0_i32, %arg1 : i32, i32, i32
  }
  func.func @transform_1(%arg0: i32, %arg1: i32) -> (i32, i32, i32) {
    %c0_i32 = arith.constant 0 : i32
    %c0_i32_0 = arith.constant 0 : i32
    return %arg0, %c0_i32, %arg1 : i32, i32, i32
  }
  func.func @transform_2(%arg0: i32, %arg1: i32) -> (i32, i32, i32) {
    %c0_i32 = arith.constant 0 : i32
    %c0_i32_0 = arith.constant 0 : i32
    %c0_i32_1 = arith.constant 0 : i32
    return %arg0, %c0_i32, %c0_i32_0 : i32, i32, i32
  }
  func.func @transform_3(%arg0: i32, %arg1: i32) -> (i32, i32, i32) {
    %c0_i32 = arith.constant 0 : i32
    %c0_i32_0 = arith.constant 0 : i32
    %c0_i32_1 = arith.constant 0 : i32
    return %arg0, %c0_i32, %c0_i32_0 : i32, i32, i32
  }
  func.func @transform_4(%arg0: i32, %arg1: i32) -> (i32, i32, i32) {
    %c0_i32 = arith.constant 0 : i32
    %c0_i32_0 = arith.constant 0 : i32
    %c0_i32_1 = arith.constant 0 : i32
    return %arg0, %c0_i32, %c0_i32_0 : i32, i32, i32
  }
}

</mosaic_0001>

<bundles_post_ra>
// kernel: tpu_custom_call.1
= control target key start
LH: loop header
LB: loop body
LE: loop exit
PB: predicated region body
PF: predicated region fallthrough
CT: control target
= control target key end

     0   :  { %10 = vsyncpa [#allocation6], 0  ;;  %s945_s0 = inlined_call_operand.hbm [shape: f32[2,4,256], index: 0, kind: input, shape index: {}]   ;;  %s946_s1 = inlined_call_operand.hbm [shape: f32[2,4,256], index: 1, kind: input, shape index: {}]   ;;  %s947_s2 = inlined_call_operand.vmem [shape: f32[2,4,1], index: 2, kind: output, shape index: {0}]   ;;  %s948_s3 = inlined_call_operand.vmem [shape: f32[2,4,1], index: 3, kind: output, shape index: {1}]   ;;  %s949_s4 = inlined_call_operand.vmem [shape: f32[2,4,1], index: 4, kind: output, shape index: {2}]  }
   0x1   :  { %12 = vsyncpa [#allocation6 + $0x1], 0 }
   0x2   :  { %13 = vsyncpa [#allocation8], 0 }
   0x3   :  { %15 = vsyncpa [#allocation8 + $0x1], 0  ;;  %s752_s15 = smov 0   ;;  %s754_s16 = smov 0  }
   0x4   :  { %s756_s17 = smov 0   ;;  %s758_s18 = smov 0  }
   0x5   :  { %s760_s19 = smov 0   ;;  %s762_s20 = smov 0  }
   0x6 LB: > { %s522_s21 = sadd.s32 4294967295, %s722_s20   ;;  %s33_s22 = sadd.s32 1, %s718_s19  ;;  %s722_s20 = sphi %s762_s20, %s21_s20   ;;  %s718_s19 = sphi %s760_s19, %s963_s19   ;;  %s714_s18 = sphi %s758_s18, %s962_s18   ;;  %s710_s17 = sphi %s756_s17, %s961_s17   ;;  %s706_s16 = sphi %s754_s16, %s960_s16   ;;  %s702_s15 = sphi %s752_s15, %s959_s15  }
   0x7   : > { %p35_p0 = scmp.ge.s32.totalorder %s33_s22, 2  ;;  %s42_s23 = sadd.s32 1, %s710_s17 }
   0x8   : > { %p49_p1 = scmp.ne.s32.totalorder %s710_s17, %s706_s16  ;;  %p50_p2 = scmp.eq.s32.totalorder %s722_s20, 0 }
   0x9   : > { %s965_s22 = smov (%p35_p0, %s33_s22), 0  ;;  %p55_p4 = scmp.ne.s32.totalorder %s706_s16, %s702_s15 }
   0xa   : > { %p788_p3 = por %p50_p2, %p49_p1  ;;  %s37_s25 = ssub.s32 %s718_s19, %s965_s22 }
   0xb   : > { %p56_p5 = scmp.eq.s32.totalorder %s522_s21, 0  ;;  %p40_p6 = scmp.eq.s32.totalorder %s37_s25, 0 }
   0xc   : > { %p554_p8 = scmp.lt.s32.totalorder %s722_s20, 2  ;;  %s804_s28 = sand.u32 1, %s710_s17  }
   0xd   : > { %p795_p7 = por %p56_p5, %p55_p4  ;;  %s541_s29 = sshll.u32 %s718_s19, 7 }
   0xe   : > { %s801_s27 = scalar_select %p40_p6, %s710_s17, %s42_s23  }
   0xf   : > { %s952_s26 = scalar_select %p795_p7, 1, 0 }
  0x10   : > { %s526_s30 = sshll.u32 %s804_s28, 3  ;;  %s813_s7 = scalar_lea.hbm %s945_s0, %s541_s29 }
  0x11   : > { %s189_s8 = scalar_lea.vmem [#allocation5], %s526_s30  ;;  %p819_p9 = pnand %p554_p8, %p788_p3 }
  0x12   : > { %s199_s9 = sshll.u32 %s189_s8, 4  ;;  %s186_s11 = scalar_lea.sflag [#allocation6], %s804_s28  ;;  %s823_s9 = int_to_ptr.vmem [resolvable:$true] %s199_s9 }
  0x13   : > { %s608_s12 = scalar_lea.hbm %s813_s7, 128  ;;  %p610_p13 = pneg %p819_p9 }
  0x14   : > { %p609_p12 = scmp.ne.s32.totalorder %s813_s7, %s608_s12  ;;  %s613_s15 = scalar_lea.hbm %s945_s0, 256 }
  0x15   : > { %p614_p2 = scmp.lt.u32.totalorder %s813_s7, %s945_s0  ;;  %p615_p3 = scmp.lt.u32.totalorder %s613_s15, %s608_s12 }
  0x16   : > { %p611_p0 = pnand %p610_p13, %p609_p12  ;;  %p617_p5 = scmp.lt.u32.totalorder %s608_s12, %s813_s7 }
  0x17   : > { %p616_p4 = por %p615_p3, %p614_p2 }
  0x18   : > { %p612_p1 = pneg %p611_p0 }
  0x19   : > { %p618_p6 = por %p617_p5, %p616_p4 }
  0x1b   : > { %p619_p8 = pnand %p618_p6, %p612_p1 }
  0x1d   : > { %622 = shalt.err (!%p619_p8)
}
  0x1e   : > { %s623_s24 = scalar_lea.vmem %s823_s9, 128  ;;  %s724_s25 = smov [#allocation5]  }
  0x1f   : > { %p624_p12 = scmp.ne.s32.totalorder %s823_s9, %s623_s24  ;;  %s628_s5 = sshll.u32 %s724_s25, 4  ;;  %s629_s5 = int_to_ptr.vmem [resolvable:$false] %s628_s5 }
  0x20   : > { %s630_s6 = scalar_lea.vmem %s629_s5, 256  ;;  %p631_p11 = scmp.lt.s32.totalorder %s823_s9, %s629_s5 }
  0x21   : > { %p626_p0 = pnand %p624_p12, %p610_p13  ;;  %p632_p2 = scmp.lt.s32.totalorder %s630_s6, %s623_s24 }
  0x23   : > { %p627_p10 = pneg %p626_p0  ;;  %p633_p3 = por %p632_p2, %p631_p11 }
  0x25   : > { %p634_p4 = pnand %p633_p3, %p627_p10 }
  0x27   : > { %637 = shalt.err (!%p634_p4)
}
  0x28   : > { %550 = dma.hbm_to_vmem [thread:$0]  (!%p819_p9), %s813_s7, 128, %s823_s9, %s186_s11  }
  0x29   : > { %p954_p1 = scmp.lt.s32.totalorder %s722_s20, 3  ;;  %p955_p5 = scmp.ge.s32.totalorder %s722_s20, 1 }
  0x2a   : > { %s866_s14 = scalar_lea.hbm %s946_s1, %s541_s29  ;;  %s210_s15 = scalar_lea.vmem [#allocation7], %s526_s30 }
  0x2b   : > { %p857_p6 = pnand %p955_p5, %p954_p1  ;;  %s220_s21 = sshll.u32 %s210_s15, 4  ;;  %s221_s21 = int_to_ptr.vmem [resolvable:$true] %s220_s21 }
  0x2c   : > { %s207_s7 = scalar_lea.sflag [#allocation8], %s804_s28  ;;  %s638_s9 = scalar_lea.hbm %s866_s14, 128 }
  0x2d   : > { %s956_s8 = scalar_select %p857_p6, 1, 0 }
  0x2e   : > { %p639_p10 = scmp.ne.s32.totalorder %s866_s14, %s638_s9  ;;  %s643_s29 = scalar_lea.hbm %s946_s1, 256 }
  0x2f   : > { %p644_p12 = scmp.lt.u32.totalorder %s866_s14, %s946_s1  ;;  %p645_p0 = scmp.lt.u32.totalorder %s643_s29, %s638_s9 }
  0x30   : > { %p641_p11 = pnand %p639_p10, %p610_p13  ;;  %p647_p3 = scmp.lt.u32.totalorder %s638_s9, %s866_s14 }
  0x31   : > { %p646_p2 = por %p645_p0, %p644_p12 }
  0x32   : > { %p642_p8 = pneg %p641_p11 }
  0x33   : > { %p648_p4 = por %p647_p3, %p646_p2 }
  0x35   : > { %p649_p1 = pnand %p648_p4, %p642_p8 }
  0x37   : > { %652 = shalt.err (!%p649_p1)
}
  0x38   : > { %s653_s28 = scalar_lea.vmem %s221_s21, 128  ;;  %s725_s30 = smov [#allocation7]  }
  0x39   : > { %p654_p5 = scmp.ne.s32.totalorder %s221_s21, %s653_s28  ;;  %s658_s5 = sshll.u32 %s725_s30, 4  ;;  %s659_s5 = int_to_ptr.vmem [resolvable:$false] %s658_s5 }
  0x3a   : > { %s660_s6 = scalar_lea.vmem %s659_s5, 256  ;;  %p661_p7 = scmp.lt.s32.totalorder %s221_s21, %s659_s5 }
  0x3b   : > { %p656_p10 = pnand %p654_p5, %p610_p13  ;;  %p662_p6 = scmp.lt.s32.totalorder %s660_s6, %s653_s28 }
  0x3d   : > { %p657_p11 = pneg %p656_p10  ;;  %p663_p0 = por %p662_p6, %p661_p7 }
  0x3f   : > { %p664_p12 = pnand %p663_p0, %p657_p11 }
  0x41   : > { %667 = shalt.err (!%p664_p12)
}
  0x42   : > { %553 = dma.hbm_to_vmem [thread:$0]  (!%p819_p9), %s866_s14, 128, %s221_s21, %s207_s7  }
  0x43   : > { %p957_p8 = scmp.ne.s32.totalorder %s956_s8, 0 }
  0x44   : > { %s231_s12 = sand.u32 (!%p957_p8), 1, %s706_s16   ;;  %p958_p13 = scmp.ne.s32.totalorder (!%p957_p8), %s952_s26, 0 }
  0x45   : > { %229 = sbr.rel (%p957_p8) target bundleno = 270 (0x10e), region = 28  ;;  %s533_s13 = sshll.u32 (!%p957_p8), %s231_s12, 3 }
  0x46   : > { %s232_s15 = scalar_lea.sflag (!%p957_p8), [#allocation6], %s231_s12  ;;  %s235_s9 = scalar_lea.vmem (!%p957_p8), [#allocation5], %s533_s13 }
  0x4c   : > { %693 = dma.done.wait (%p958_p13), %s232_s15, 128  }
  0x4d   : > { %695 = vsyncadd (%p958_p13), %s232_s15, 4294967168  ;;  %s241_s11 = scalar_lea.sflag [#allocation8], %s231_s12  ;;  %s244_s23 = scalar_lea.vmem [#allocation7], %s533_s13 }
  0x4e   : > { %697 = dma.done.wait (%p958_p13), %s241_s11, 128  }
  0x4f   : > { %699 = vsyncadd (%p958_p13), %s241_s11, 4294967168  ;;  %vm299_vm0 = vcmask 3072   ;;  %v726_v0 = vmov 0.0   ;;  %v303_v1 = vld [vmem:[%s235_s9] sm:$0xff]  ;;  %v310_v2 = vld [vmem:[%s244_s23] sm:$0xff]  ;;  %vm318_vm1 = vcmask 1043456  }
  0x50   : > { %300 = vst.msk [vmem:[#allocation2] sm:$0xf] %vm299_vm0, %v726_v0  ;;  %301 = vst.msk [vmem:[#allocation3] sm:$0xf] %vm299_vm0, %v726_v0  ;;  %v538_v3 = vmul.f32 -1.442695, %v303_v1 }
  0x51   : > { %302 = vst.msk [vmem:[#allocation4] sm:$0xf] %vm299_vm0, %v726_v0  ;;  %v311_v4 = vmul.f32 0.9, %v310_v2  ;;  %p283_p7 = scmp.lt.s32.totalorder %s714_s18, 1 }
  0x52   : > { %604 = vpow2.f32 %v538_v3 }
  0x53   : > { %v312_v5 = vadd.f32 0.025, %v311_v4  ;;  %s967_s18 = smov (!%p283_p7, %s714_s18), 1 }
  0x54   : > { %s535_s26 = sshll.u32 %s967_s18, 2 }
  0x55   : > { %v340_v6 = vcombine.high %v312_v5, %v312_v5  ;;  %v342_v7 = vsel %vm318_vm1, %v312_v5, 0.0  ;;  %s294_s14 = scalar_lea.vmem %s949_s4, %s535_s26  ;;  %s286_s18 = scalar_lea.vmem %s947_s2, %s535_s26 }
  0x56   : > { %s290_s25 = scalar_lea.vmem %s948_s3, %s535_s26 }
  0x57   : > { %v343_v8 = vsel %vm318_vm1, %v340_v6, 0.0  ;;  %v313_v26 = vld [vmem:[#allocation2] sm:$0xf]  ;;  %v327_v29 = vld [vmem:[#allocation3] sm:$0xf] }
  0x58   : > { %v344_v9 = vadd.f32 %v343_v8, %v342_v7  ;;  %v338_v22 = vld [vmem:[#allocation4] sm:$0xf] }
  0x5a   : > { %345 = vadd.xlane.f32.xlu1 %v344_v9 }
  0x5c   : > { %v605_v10 = vpop.eup %604 }
  0x5d   : > { %v307_v11 = vadd.f32 1.0, %v605_v10 }
  0x5f   : > { %606 = vrcp.f32 %v307_v11 }
  0x69   : > { %v607_v12 = vpop.eup %606 }
  0x6a   : > { %v314_v13 = vmul.f32 %v607_v12, %v312_v5  ;;  %v329_v14 = vcombine.high %v607_v12, %v607_v12  ;;  %v331_v18 = vsel %vm318_vm1, %v607_v12, 0.0 }
  0x6c   : > { %v316_v15 = vcombine.high %v314_v13, %v314_v13  ;;  %v319_v16 = vsel %vm318_vm1, %v314_v13, 0.0  ;;  %v332_v19 = vsel %vm318_vm1, %v329_v14, 0.0 }
  0x6d   : > { %v333_v21 = vadd.f32 %v332_v19, %v331_v18 }
  0x6e   : > { %v320_v17 = vsel %vm318_vm1, %v316_v15, 0.0 }
  0x6f   : > { %v321_v20 = vadd.f32 %v320_v17, %v319_v16 }
  0x71   : > { %322 = vadd.xlane.f32.xlu0 %v321_v20 }
  0x75   : > { %334 = vadd.xlane.f32.xlu0 %v333_v21 }
  0xe7   : > { %v346_v23 = vpop.xlane.xlu1 %345 }
  0xe8   : > { %v347_v24 = vadd.f32 %v346_v23, %v338_v22 }
  0xea   : > { %348 = vst.msk [vmem:[#allocation4] sm:$0xf] %vm299_vm0, %v347_v24 }
  0xf1   : > { %v356_v25 = vld [vmem:[#allocation4] sm:$0xf] }
  0xf2   : > { %357 = vst.msk [vmem:[%s294_s14] sm:$0xf] %vm299_vm0, %v356_v25 }
  0xfe   : > { %v323_v27 = vpop.xlane.xlu0 %322 }
  0xff   : > { %v324_v28 = vadd.f32 %v323_v27, %v313_v26 }
 0x101   : > { %326 = vst.msk [vmem:[#allocation2] sm:$0xf] %vm299_vm0, %v324_v28 }
 0x102   : > { %v335_v30 = vpop.xlane.xlu0 %334 }
 0x103   : > { %v336_v31 = vadd.f32 %v335_v30, %v327_v29 }
 0x105   : > { %337 = vst.msk [vmem:[#allocation3] sm:$0xf] %vm299_vm0, %v336_v31 }
 0x108   : > { %v352_v32 = vld [vmem:[#allocation2] sm:$0xf] }
 0x109   : > { %353 = vst.msk [vmem:[%s286_s18] sm:$0xf] %vm299_vm0, %v352_v32 }
 0x10c   : > { %v354_v33 = vld [vmem:[#allocation3] sm:$0xf] }
 0x10d   : > { %355 = vst.msk [vmem:[%s290_s25] sm:$0xf] %vm299_vm0, %v354_v33 }
 0x10e PF: > { %s21_s20 = sadd.s32 1, %s722_s20   ;;  %s959_s15 = smov %s706_s16 }
 0x10f   : > { %p18_p9 = scmp.ge.s32.totalorder %s21_s20, 4   ;;  %s960_s16 = smov %s710_s17 }
 0x110   : > { %s961_s17 = smov %s801_s27  ;;  %s962_s18 = smov %s718_s19 }
 0x111   : > { %s963_s19 = smov %s965_s22  ;;  %20 = sbr.rel (!%p18_p9) target bundleno = 6 (0x6), region = 113 }
 0x118   :  { %405 = vsyncpa [#allocation6], 1 }
 0x119   :  { %407 = vsyncpa [#allocation6 + $0x1], 1 }
 0x11a   :  { %408 = vsyncpa [#allocation8], 1 }
 0x11b   :  { %410 = vsyncpa [#allocation8 + $0x1], 1 }

</bundles_post_ra>
